<compile_context>
chip_gen: v6e
topology: v6e:2x2x1
jax: 0.10.0
libtpu: 0.0.40
codegen_flags: <defaults>
</compile_context>

<pallas_src>
import numpy as np
import jax
import jax.numpy as jnp
from jax.experimental import pallas as pl
from jax.experimental.pallas import tpu as pltpu

LANE = 128
_VMEM_LIMIT = 32 * 1024 * 1024   # safe on v5e/v6e/v7x scoped VMEM


def _round_up(x, m):
    return ((x + m - 1) // m) * m


def _pad2d(x, rows, cols):
    return jnp.pad(x, ((0, rows - x.shape[0]), (0, cols - x.shape[1])))


# ---------------------------------------------------------------------------
# Kernel 1: per-node w1 = Linear1(feat)   (N rows instead of E rows)
# ---------------------------------------------------------------------------
def node_w1_kernel(feat_ref, w1t_ref, b1_ref, w1_ref):
    w1_ref[...] = (jnp.dot(feat_ref[...], w1t_ref[...],
                           preferred_element_type=jnp.float32) + b1_ref[...])


def node_w1(feat_p, w1t_p, b1_p, *, block_n):
    Np, inp_dim = feat_p.shape
    Dp = w1t_p.shape[1]
    return pl.pallas_call(
        node_w1_kernel,
        out_shape=jax.ShapeDtypeStruct((Np, Dp), jnp.float32),
        grid_spec=pltpu.PrefetchScalarGridSpec(
            num_scalar_prefetch=0,
            grid=(Np // block_n,),
            in_specs=[pl.BlockSpec((block_n, inp_dim), lambda i: (i, 0)),
                      pl.BlockSpec((inp_dim, Dp), lambda i: (0, 0)),
                      pl.BlockSpec((1, Dp), lambda i: (0, 0))],
            out_specs=pl.BlockSpec((block_n, Dp), lambda i: (i, 0))),
        compiler_params=pltpu.CompilerParams(
            dimension_semantics=("parallel",),
            vmem_limit_bytes=_VMEM_LIMIT),
    )(feat_p, w1t_p, b1_p)


# ---------------------------------------------------------------------------
# Kernel 2: fused edge messages + dst scatter-sum + node update.
# Grid iterates over edge chunks (sorted by dst, grouped per node tile).
# Scalar-prefetched per-chunk metadata: tile id, first-of-tile, last-of-tile.
# ---------------------------------------------------------------------------
def fused_edge_node_kernel(ct_ref, cf_ref, cl_ref,                 # SMEM prefetch
                           w1e_ref, et_ref, norm_ref, ldst_ref, feat_ref,
                           relT_ref, w2s_ref, w2d_ref, w2c_ref, b2_ref,
                           slw_ref, wlt_ref, bl_ref,
                           out_ref, acc_ref):
    j = pl.program_id(0)
    ce = w1e_ref.shape[0]        # edges per chunk
    bn = acc_ref.shape[0]        # node rows per tile
    nrel = relT_ref.shape[0]     # padded relation-table rows

    @pl.when(cf_ref[j] == 1)     # first chunk of this node tile
    def _():
        acc_ref[...] = jnp.zeros_like(acc_ref)

    # relation-embedding lookup in-kernel: one_hot(etype) @ table
    rel_oh = (et_ref[...] ==
              jax.lax.broadcasted_iota(jnp.int32, (ce, nrel), 1)
              ).astype(jnp.float32)
    t = jnp.dot(rel_oh, relT_ref[...], preferred_element_type=jnp.float32)
    w1 = w1e_ref[...]
    # weight2(cat([t+w1, t-w1, t*w1])) == t@(A+B) + w1@(A-B) + (t*w1)@C
    m = (jnp.dot(t, w2s_ref[...], preferred_element_type=jnp.float32)
         + jnp.dot(w1, w2d_ref[...], preferred_element_type=jnp.float32)
         + jnp.dot(t * w1, w2c_ref[...], preferred_element_type=jnp.float32)
         + b2_ref[...]) * norm_ref[...]           # dummy edges: norm 0 -> msg 0

    # tile-local scatter-add of messages onto the accumulator (one-hot matmul).
    # ldst_ref carries one chunk of local dst ids per sublane row; pick row j%8.
    ldst_row = ldst_ref[pl.ds(j % 8, 1), :]                          # (1, ce)
    scat_t = (jax.lax.broadcasted_iota(jnp.int32, (bn, ce), 0) == ldst_row
              ).astype(jnp.float32)                                  # (bn, ce)
    acc_ref[...] += jnp.dot(scat_t, m, preferred_element_type=jnp.float32)

    @pl.when(cl_ref[j] == 1)     # last chunk of this node tile -> node update
    def _():
        h = (jnp.dot(feat_ref[...], slw_ref[...],
                     preferred_element_type=jnp.float32) + acc_ref[...])
        nf = (jnp.dot(h, wlt_ref[...], preferred_element_type=jnp.float32)
              + bl_ref[...])
        out_ref[...] = jnp.maximum(nf, 0.0)


def fused_edge_node(chunk_tile, chunk_first, chunk_last,
                    w1e_p, et_col, norm_col, ldst2d, feat_p,
                    relT_p, w2s_p, w2d_p, w2c_p, b2_p, slw_p, wlt_p, bl_p,
                    *, block_n, chunk_e):
    Np, inp_dim = feat_p.shape
    Dp = w1e_p.shape[1]
    Rp = relT_p.shape[0]
    num_chunks = chunk_tile.shape[0]

    edge_row = lambda j, ct, cf, cl: (j, 0)
    ldst_row = lambda j, ct, cf, cl: (j // 8, 0)
    node_row = lambda j, ct, cf, cl: (ct[j], 0)
    const = lambda j, ct, cf, cl: (0, 0)

    return pl.pallas_call(
        fused_edge_node_kernel,
        out_shape=jax.ShapeDtypeStruct((Np, Dp), jnp.float32),
        grid_spec=pltpu.PrefetchScalarGridSpec(
            num_scalar_prefetch=3,
            grid=(num_chunks,),
            in_specs=[
                pl.BlockSpec((chunk_e, Dp), edge_row),       # w1[src] per edge
                pl.BlockSpec((chunk_e, 1), edge_row),        # etype
                pl.BlockSpec((chunk_e, 1), edge_row),        # norm
                pl.BlockSpec((8, chunk_e), ldst_row),        # local dst (lane axis)
                pl.BlockSpec((block_n, inp_dim), node_row),  # node feat tile
                pl.BlockSpec((Rp, Dp), const),               # attn_rel_emb
                pl.BlockSpec((Dp, Dp), const),               # A+B
                pl.BlockSpec((Dp, Dp), const),               # A-B
                pl.BlockSpec((Dp, Dp), const),               # C
                pl.BlockSpec((1, Dp), const),                # b2
                pl.BlockSpec((inp_dim, Dp), const),          # self_loop_weight
                pl.BlockSpec((Dp, Dp), const),               # Wl.T
                pl.BlockSpec((1, Dp), const),                # bl
            ],
            out_specs=pl.BlockSpec((block_n, Dp), node_row),
            scratch_shapes=[pltpu.VMEM((block_n, Dp), jnp.float32)]),
        compiler_params=pltpu.CompilerParams(
            dimension_semantics=("arbitrary",),
            vmem_limit_bytes=_VMEM_LIMIT),
    )(chunk_tile, chunk_first, chunk_last,
      w1e_p, et_col, norm_col, ldst2d, feat_p,
      relT_p, w2s_p, w2d_p, w2c_p, b2_p, slw_p, wlt_p, bl_p)


# ---------------------------------------------------------------------------
# Full node-feature pass.
# ---------------------------------------------------------------------------
def cggcn_node_features(feat, src, dst, etype, cg_norm, params,
                        *, block_n=256, chunk_e=1024):
    (W1, b1, W2, b2, attn_rel_emb, self_loop_weight, Wl, bl) = params
    N, inp_dim = feat.shape
    out_dim = W1.shape[0]
    E = src.shape[0]
    n_rels = attn_rel_emb.shape[0]

    Dp = _round_up(out_dim, LANE)
    Rp = _round_up(n_rels, LANE)
    block_n = min(block_n, _round_up(N, 8))
    chunk_e = min(chunk_e, _round_up(max(E, 8), 8))
    Np = _round_up(N, block_n)
    num_tiles = Np // block_n

    src = src.astype(jnp.int32)
    dst = dst.astype(jnp.int32)
    etype = etype.astype(jnp.int32)
    cg_norm = cg_norm.astype(jnp.float32)

    # ---- parameters: weight2 algebraic fusion + 128-lane zero padding -------
    A = W2[:, :out_dim].T
    B = W2[:, out_dim:2 * out_dim].T
    C = W2[:, 2 * out_dim:].T
    w1t_p = _pad2d(W1.T, inp_dim, Dp)
    b1_p = _pad2d(b1[None, :], 1, Dp)
    w2s_p = _pad2d(A + B, Dp, Dp)
    w2d_p = _pad2d(A - B, Dp, Dp)
    w2c_p = _pad2d(C, Dp, Dp)
    b2_p = _pad2d(b2[None, :], 1, Dp)
    relT_p = _pad2d(attn_rel_emb, Rp, Dp)
    slw_p = _pad2d(self_loop_weight, inp_dim, Dp)
    wlt_p = _pad2d(Wl.T, Dp, Dp)
    bl_p = _pad2d(bl[None, :], 1, Dp)

    feat_p = _pad2d(feat, Np, inp_dim)     # rows only; keep natural lane width

    # ---- kernel 1: w1 per node ----------------------------------------------
    w1_nodes = node_w1(feat_p, w1t_p, b1_p, block_n=block_n)

    # ---- sort edges by dst and lay them out in per-node-tile chunks ---------
    order = jnp.argsort(dst)
    dst_s = dst[order]
    src_s = src[order]
    etype_s = etype[order]
    norm_s = cg_norm[order]
    tile_s = dst_s // block_n

    counts = jax.ops.segment_sum(jnp.ones((E,), jnp.int32), dst // block_n,
                                 num_segments=num_tiles)
    orig_off = jnp.cumsum(counts) - counts
    padded_counts = jnp.maximum(((counts + chunk_e - 1) // chunk_e) * chunk_e,
                                chunk_e)            # every tile gets >=1 chunk
    pad_off = jnp.cumsum(padded_counts) - padded_counts

    total_padded = _round_up(E, chunk_e) + num_tiles * chunk_e   # static bound
    num_chunks = total_padded // chunk_e

    pos = pad_off[tile_s] + (jnp.arange(E, dtype=jnp.int32) - orig_off[tile_s])

    # TODO(synk): the w1[src] row gather stays an XLA gather; it could be moved
    # into the Pallas DMA pipeline with pl.Element row blocks if it dominates.
    gather_idx = jnp.zeros((total_padded,), jnp.int32).at[pos].set(src_s)
    w1e_p = jnp.take(w1_nodes, gather_idx, axis=0)            # (total_padded, Dp)
    et_col = jnp.zeros((total_padded,), jnp.int32).at[pos].set(etype_s)[:, None]
    norm_col = (jnp.zeros((total_padded,), jnp.float32)
                .at[pos].set(norm_s))[:, None]                # dummy edges -> 0
    ldst_vals = (jnp.zeros((total_padded,), jnp.int32)
                 .at[pos].set(dst_s - tile_s * block_n))
    ldst2d = jnp.zeros((_round_up(num_chunks, 8), chunk_e), jnp.int32)
    ldst2d = ldst2d.at[:num_chunks].set(ldst_vals.reshape(num_chunks, chunk_e))

    chunk_start = pad_off // chunk_e
    nchunk_tile = padded_counts // chunk_e
    cid = jnp.arange(num_chunks, dtype=jnp.int32)
    chunk_tile = (jnp.searchsorted(chunk_start, cid, side='right') - 1
                  ).astype(jnp.int32)
    chunk_first = (cid == chunk_start[chunk_tile]).astype(jnp.int32)
    chunk_last = (cid == chunk_start[chunk_tile]
                  + nchunk_tile[chunk_tile] - 1).astype(jnp.int32)

    # ---- kernel 2: fused messages + scatter-sum + node update ---------------
    # TODO(synk): optionally cast matmul operands to bf16 (f32 accumulation) for
    # ~2x MXU / half HBM bytes; kept f32 here to stay within the 1e-3 check.
    nf_p = fused_edge_node(chunk_tile, chunk_first, chunk_last,
                           w1e_p, et_col, norm_col, ldst2d, feat_p,
                           relT_p, w2s_p, w2d_p, w2c_p, b2_p,
                           slw_p, wlt_p, bl_p,
                           block_n=block_n, chunk_e=chunk_e)
    return nf_p[:N, :out_dim]


# ---------------------------------------------------------------------------
# Per-graph post-processing — vectorized XLA segment ops (no Python loop).
# ---------------------------------------------------------------------------
def postprocess(nf, index1, index2, f2p, tar_rel, graph_id, num_graphs,
                zero_path, num_g_rels):
    N, D = nf.shape
    R = num_g_rels + 1
    node_idx = jnp.arange(N, dtype=jnp.int32)

    # batch_rel_emds: last-write-wins scatter of relation-node features by f2
    rel_mask = index2 != 0
    slot = jnp.where(rel_mask, graph_id * R + f2p, num_graphs * R)   # dummy slot
    last_node = jax.ops.segment_max(jnp.where(rel_mask, node_idx, -1), slot,
                                    num_segments=num_graphs * R + 1)[:num_graphs * R]
    has_rel = last_node >= 0
    rel_rows = jnp.where(has_rel[:, None],
                         nf[jnp.clip(last_node, 0, N - 1)], 0.0)
    batch_rel_emds = rel_rows.reshape(num_graphs, R, D)

    # target relation = first node with tar_rel == 1 in each graph
    first_tgt = jax.ops.segment_min(jnp.where(tar_rel == 1, node_idx, N),
                                    graph_id, num_segments=num_graphs)
    target = jnp.where((first_tgt < N)[:, None],
                       nf[jnp.clip(first_tgt, 0, N - 1)], 0.0)

    # mask-aware per-graph softmax over path nodes (NaN-free even if empty)
    pmask = index1 == 1
    logits = jnp.sum(nf * target[graph_id], axis=1)
    masked = jnp.where(pmask, logits, -jnp.inf)
    has_path = jax.ops.segment_sum(pmask.astype(jnp.int32), graph_id,
                                   num_segments=num_graphs) > 0
    gmax = jax.ops.segment_max(masked, graph_id, num_segments=num_graphs)
    gmax = jnp.where(has_path, gmax, 0.0)
    e = jnp.where(pmask, jnp.exp(logits - gmax[graph_id]), 0.0)
    denom = jax.ops.segment_sum(e, graph_id, num_segments=num_graphs)
    num = jax.ops.segment_sum(e[:, None] * nf, graph_id, num_segments=num_graphs)
    safe_denom = jnp.where(denom > 0, denom, 1.0)[:, None]
    path = jnp.where(has_path[:, None], num / safe_denom, zero_path)

    return batch_rel_emds, target, path


# ---------------------------------------------------------------------------
if __name__ == "__main__":
    inp_dim, out_dim = 32, 32
    num_g_rels = 5          # `num_rels` ctor arg
    n_attn_rels = 10        # hard-coded self.num_rels in the module
    batch_nodes = [10, 6]
    N = sum(batch_nodes)
    E = 24

    keys = jax.random.split(jax.random.PRNGKey(0), 8)
    feat = jax.random.normal(keys[0], (N, inp_dim), jnp.float32)
    src = jax.random.randint(keys[1], (E,), 0, N)
    dst = jax.random.randint(keys[2], (E,), 0, N)
    etype = jax.random.randint(keys[3], (E,), 0, n_attn_rels)
    cg_norm = jax.random.uniform(keys[4], (E,), jnp.float32, 0.5, 1.5)

    # node annotations (index1 = path nodes, index2 != 0 = relation nodes,
    # f2 = relation id (before +1 offset), tar_rel = target-relation node)
    index1 = jnp.array([0, 1, 1, 0, 0, 0, 1, 0, 0, 0,   0, 1, 0, 0, 1, 0], jnp.int32)
    index2 = jnp.array([0, 0, 0, 1, 1, 0, 0, 1, 0, 0,   0, 0, 1, 1, 0, 0], jnp.int32)
    f2_raw = jnp.array([0, 0, 0, 1, 2, 0, 0, 3, 0, 0,   0, 0, 0, 2, 0, 0], jnp.int32)
    tar_rel = jnp.array([0, 0, 0, 0, 0, 1, 0, 0, 0, 0,  0, 0, 0, 0, 0, 1], jnp.int32)
    f2p = f2_raw + 1  # index_offset = 1

    # deterministic parameter init (synthetic, not a checkpoint load)
    pk = jax.random.split(jax.random.PRNGKey(42), 9)
    s = 0.1
    W1 = jax.random.normal(pk[0], (out_dim, inp_dim), jnp.float32) * s      # self.weight
    b1 = jax.random.normal(pk[1], (out_dim,), jnp.float32) * s
    W2 = jax.random.normal(pk[2], (out_dim, 3 * out_dim), jnp.float32) * s  # self.weight2
    b2 = jax.random.normal(pk[3], (out_dim,), jnp.float32) * s
    attn_rel_emb = jax.random.normal(pk[4], (n_attn_rels, out_dim), jnp.float32) * s
    self_loop_weight = jax.random.normal(pk[5], (inp_dim, out_dim), jnp.float32) * s
    zero_path = jax.random.normal(pk[6], (1, out_dim), jnp.float32) * s
    Wl = jax.random.normal(pk[7], (out_dim, out_dim), jnp.float32) * s      # self.line
    bl = jax.random.normal(pk[8], (out_dim,), jnp.float32) * s
    # self.bn defined but unused in forward; bias=None; dropout/edge_dropout=0.

    params = (W1, b1, W2, b2, attn_rel_emb, self_loop_weight, Wl, bl)

    # ---- Pallas pipeline ----
    cg_node_feats = cggcn_node_features(
        feat, src, dst, etype, cg_norm, params, block_n=256, chunk_e=1024)

    graph_id = jnp.asarray(np.repeat(np.arange(len(batch_nodes)), batch_nodes),
                           jnp.int32)
    batch_rel_emds, target_rel_emd, path_agg_emd = postprocess(
        cg_node_feats, index1, index2, f2p, tar_rel, graph_id,
        len(batch_nodes), zero_path, num_g_rels)

    # ---- reference check (pure JAX, original formulation) ----
    src_feat_r = feat[src]
    et_r = attn_rel_emb[etype]
    w1_r = src_feat_r @ W1.T + b1
    m_r = (jnp.concatenate([et_r + w1_r, et_r - w1_r, et_r * w1_r], axis=1)
           @ W2.T + b2) * cg_norm[:, None]
    agg_r = jax.ops.segment_sum(m_r, dst, num_segments=N)
    h_r = feat @ self_loop_weight + agg_r
    nf_r = jnp.maximum(h_r @ Wl.T + bl, 0.0)
    assert jnp.allclose(cg_node_feats, nf_r, atol=1e-3, rtol=1e-3)

    # loop reference for per-graph outputs (mirrors the PyTorch code)
    start = 0
    rel_ref, tgt_ref, path_ref = [], [], []
    for n in batch_nodes:
        nf = nf_r[start:start + n]
        i1 = index1[start:start + n]
        i2 = index2[start:start + n]
        tf2 = f2p[start:start + n]
        tr = tar_rel[start:start + n]
        rel = jnp.zeros((num_g_rels + 1, out_dim), jnp.float32)
        rel = rel.at[tf2[i2 != 0]].set(nf[i2 != 0])
        rel_ref.append(rel)
        tgt = nf[tr == 1][0]
        tgt_ref.append(tgt)
        pe = nf[i1 == 1]
        if pe.shape[0] == 0:
            path = zero_path[0]
        else:
            al = jax.nn.softmax(pe @ tgt)
            path = (pe * al[:, None]).sum(0)
        path_ref.append(path)
        start += n
    rel_ref = jnp.stack(rel_ref, 0)
    tgt_ref = jnp.stack(tgt_ref, 0)
    path_ref = jnp.stack(path_ref, 0)
    assert jnp.allclose(batch_rel_emds, rel_ref, atol=1e-3, rtol=1e-3)
    assert jnp.allclose(target_rel_emd, tgt_ref, atol=1e-3, rtol=1e-3)
    assert jnp.allclose(path_agg_emd, path_ref, atol=1e-3, rtol=1e-3)

    jax.block_until_ready((batch_rel_emds, target_rel_emd, path_agg_emd))
    assert batch_rel_emds.shape == (len(batch_nodes), num_g_rels + 1, out_dim)
    assert target_rel_emd.shape == (len(batch_nodes), out_dim)
    assert path_agg_emd.shape == (len(batch_nodes), out_dim)
    print("KERNEL_OK")
</pallas_src>

<mosaic_0001>
module attributes {stable_mosaic.version = 11 : i64} {
  func.func @node_w1_kernel(%arg0: i32, %arg1: memref<16x32xf32, #tpu.memory_space<vmem>>, %arg2: memref<32x128xf32, #tpu.memory_space<vmem>>, %arg3: memref<1x128xf32, #tpu.memory_space<vmem>>, %arg4: memref<16x128xf32, #tpu.memory_space<vmem>>) attributes {dimension_semantics = [#tpu.dimension_semantics<parallel>], iteration_bounds = array<i64: 1>, scalar_prefetch = 0 : i64, scratch_operands = 0 : i64, tpu.core_type = #tpu.core_type<tc>, window_params = [{transform_indices = @transform_0, window_bounds = array<i64: 16, 32>}, {pipeline_mode = #tpu.pipeline_mode<synchronous>, transform_indices = @transform_1, window_bounds = array<i64: 32, 128>}, {pipeline_mode = #tpu.pipeline_mode<synchronous>, transform_indices = @transform_2, window_bounds = array<i64: 1, 128>}, {transform_indices = @transform_3, window_bounds = array<i64: 16, 128>}]} {
    %c0 = arith.constant 0 : index
    %c0_0 = arith.constant 0 : index
    %0 = vector.load %arg1[%c0, %c0_0] : memref<16x32xf32, #tpu.memory_space<vmem>>, vector<16x32xf32>
    %c0_1 = arith.constant 0 : index
    %c0_2 = arith.constant 0 : index
    %1 = vector.load %arg2[%c0_1, %c0_2] : memref<32x128xf32, #tpu.memory_space<vmem>>, vector<32x128xf32>
    %cst = arith.constant dense<0.000000e+00> : vector<16x128xf32>
    %2 = tpu.matmul %0, %1, %cst {dimension_numbers = #tpu.dot_dimension_numbers<[1], [0], [0], [1], [0, 0, 1, 1], [], []>} : vector<16x32xf32>, vector<32x128xf32>, vector<16x128xf32> -> vector<16x128xf32>
    %c0_3 = arith.constant 0 : index
    %c0_4 = arith.constant 0 : index
    %3 = vector.load %arg3[%c0_3, %c0_4] : memref<1x128xf32, #tpu.memory_space<vmem>>, vector<1x128xf32>
    %4 = vector.broadcast %3 : vector<1x128xf32> to vector<16x128xf32>
    %5 = arith.addf %2, %4 : vector<16x128xf32>
    %c0_5 = arith.constant 0 : index
    %c0_6 = arith.constant 0 : index
    %6 = vector.load %arg4[%c0_5, %c0_6] : memref<16x128xf32, #tpu.memory_space<vmem>>, vector<16x128xf32>
    tpu.vector_store %arg4[%c0_5, %c0_6], %5 {strides = array<i32>} : memref<16x128xf32, #tpu.memory_space<vmem>>, vector<16x128xf32>,
    return
  }
  func.func @transform_0(%arg0: i32) -> (i32, i32) {
    %c0_i32 = arith.constant 0 : i32
    %c0_i32_0 = arith.constant 0 : i32
    return %arg0, %c0_i32 : i32, i32
  }
  func.func @transform_1(%arg0: i32) -> (i32, i32) {
    %c0_i32 = arith.constant 0 : i32
    %c0_i32_0 = arith.constant 0 : i32
    %c0_i32_1 = arith.constant 0 : i32
    return %c0_i32, %c0_i32_0 : i32, i32
  }
  func.func @transform_2(%arg0: i32) -> (i32, i32) {
    %c0_i32 = arith.constant 0 : i32
    %c0_i32_0 = arith.constant 0 : i32
    %c0_i32_1 = arith.constant 0 : i32
    return %c0_i32, %c0_i32_0 : i32, i32
  }
  func.func @transform_3(%arg0: i32) -> (i32, i32) {
    %c0_i32 = arith.constant 0 : i32
    %c0_i32_0 = arith.constant 0 : i32
    return %arg0, %c0_i32 : i32, i32
  }
}

</mosaic_0001>

<bundles_post_ra>
// kernel: tpu_custom_call.1
= control target key start
LH: loop header
LB: loop body
LE: loop exit
PB: predicated region body
PF: predicated region fallthrough
CT: control target
= control target key end

     0   :  { %8 = vsyncpa [#allocation3], 0  ;;  %s297_s0 = inlined_call_operand.hbm [shape: f32[16,32], index: 0, kind: input, shape index: {}]   ;;  %s298_s1 = inlined_call_operand.hbm [shape: f32[32,128], index: 1, kind: input, shape index: {}]   ;;  %s299_s2 = inlined_call_operand.vmem [shape: f32[1,128], index: 2, kind: input, shape index: {}]   ;;  %s300_s3 = inlined_call_operand.hbm [shape: f32[16,128], index: 3, kind: output, shape index: {}]  }
   0x1   :  { %9 = vsyncpa [#allocation6], 0 }
   0x2   :  { %10 = vsyncpa [#allocation4], 0  ;;  %s249_s12 = smov [#allocation2]  }
   0x3   :  { %s16_s13 = sshll.u32 %s249_s12, 4  ;;  %s17_s13 = int_to_ptr.vmem [resolvable:$true] %s16_s13 }
   0x4   :  { %s191_s14 = scalar_lea.vmem %s17_s13, 256  ;;  %p196_p1 = scmp.lt.s32.totalorder %s17_s13, %s17_s13 }
   0x5   :  { %p192_p0 = scmp.ne.s32.totalorder %s17_s13, %s191_s14  ;;  %p197_p2 = scmp.lt.s32.totalorder %s191_s14, %s191_s14 }
   0x7   :  { %p198_p3 = por %p197_p2, %p196_p1 }
   0x9   :  { %p199_p4 = pnand %p198_p3, %p192_p0 }
   0xb   :  { %202 = shalt.err (!%p199_p4)
}
   0xc   :  { %s250_s15 = smov 128   ;;  %s251_s16 = smov 8  }
   0xd   :  { %22 = dma.hbm_to_vmem [thread:$0]  %s297_s0, 256, %s17_s13, [#allocation3], %s250_s15, %s250_s15, %s251_s16  }
   0xe   :  { %s252_s19 = smov [#allocation5]  }
   0xf   :  { %s28_s20 = sshll.u32 %s252_s19, 4  ;;  %s29_s20 = int_to_ptr.vmem [resolvable:$true] %s28_s20 }
  0x10   :  { %s211_s21 = scalar_lea.vmem %s29_s20, 512  ;;  %p216_p6 = scmp.lt.s32.totalorder %s29_s20, %s29_s20 }
  0x11   :  { %p212_p5 = scmp.ne.s32.totalorder %s29_s20, %s211_s21  ;;  %p217_p7 = scmp.lt.s32.totalorder %s211_s21, %s211_s21 }
  0x13   :  { %p218_p8 = por %p217_p7, %p216_p6 }
  0x15   :  { %p219_p9 = pnand %p218_p8, %p212_p5 }
  0x17   :  { %222 = shalt.err (!%p219_p9)
}
  0x18   :  { %34 = dma.hbm_to_vmem [thread:$0]  %s298_s1, 512, %s29_s20, [#allocation6], %s250_s15, %s250_s15, %s251_s16  }
  0x19   :  { %243 = dma.done.wait [#allocation3], 256  }
  0x1a   :  { %244 = vsyncadd [#allocation3], 4294967040 }
  0x1b   :  { %245 = dma.done.wait [#allocation6], 512  }
  0x1c   :  { %246 = vsyncadd [#allocation6], 4294966784  ;;  %vm56_vm0 = vcmask 261120   ;;  %v48_v0 = vld [vmem:[#allocation5 + $0x18] sm:$0xff]  ;;  %v47_v1 = vld [vmem:[#allocation5 + $0x10] sm:$0xff]  ;;  %s253_s24 = smov [#allocation7]  }
  0x1d   :  { %167 = vmatprep.subr.mxu0 %v48_v0  ;;  %v43_v2 = vld [vmem:[#allocation2] sm:$0xff]  ;;  %v46_v3 = vld [vmem:[#allocation5 + $0x8] sm:$0xff]  ;;  %v45_v4 = vld [vmem:[#allocation5] sm:$0xff]  ;;  %s145_s25 = sshll.u32 %s253_s24, 4  ;;  %s146_s25 = int_to_ptr.vmem [resolvable:$true] %s145_s25 }
  0x1e   :  { %168 = vmatpush3.msra.mxu0 %v48_v0  ;;  %175 = vmatprep.mubr.msk.f32.mxu0 %vm56_vm0, %v43_v2  ;;  %v44_v5 = vld [vmem:[#allocation2 + $0x8] sm:$0xff]  ;;  %v158_v6 = vld [vmem:[%s299_s2] ss:$0 sm:$0xff]  ;;  %s223_s26 = scalar_lea.vmem %s146_s25, 256  ;;  %p228_p11 = scmp.lt.s32.totalorder %s146_s25, %s146_s25 }
  0x1f   :  { %169 = vmatprep.subr.mxu0 %v47_v1  ;;  %p224_p10 = scmp.ne.s32.totalorder %s146_s25, %s223_s26  ;;  %p229_p12 = scmp.lt.s32.totalorder %s223_s26, %s223_s26 }
  0x20   :  { %170 = vmatpush3.msra.mxu0 %v47_v1 }
  0x21   :  { %171 = vmatprep.subr.mxu0 %v46_v3  ;;  %p230_p13 = por %p229_p12, %p228_p11 }
  0x22   :  { %172 = vmatpush3.msra.mxu0 %v46_v3 }
  0x23   :  { %173 = vmatprep.subr.mxu0 %v45_v4  ;;  %p231_p0 = pnand %p230_p13, %p224_p10 }
  0x24   :  { %174 = vmatpush3.msra.mxu0 %v45_v4 }
  0x25   :  { %176 = vmatmul.mubr.msk.f32.vlgmr.msra.gmra.mxu0 %vm56_vm0, %v44_v5 }
  0xe5   :  { %v177_v7 = vpop.f32.mrf.mxu0 }
  0xe6   :  { %v135_v8 = vadd.f32 %v177_v7, %v158_v6 }
  0xe7   :  { %v129_v9 = vpop.f32.mrf.mxu0 }
  0xe8   :  { %139 = vst [vmem:[#allocation7 + $0x8] sm:$0xff] %v135_v8  ;;  %v130_v10 = vadd.f32 %v158_v6, %v129_v9 }
  0xea   :  { %138 = vst [vmem:[#allocation7] sm:$0xff] %v130_v10 }
  0xeb   :  { %234 = shalt.err (!%p231_p0)
}
  0xec   :  { %151 = dma.vmem_to_hbm [thread:$0]  %s146_s25, 256, %s300_s3, [#allocation4], %s250_s15, %s250_s15, %s251_s16  }
  0xed   :  { %247 = dma.done.wait [#allocation4], 256  }
  0xee   :  { %248 = vsyncadd [#allocation4], 4294967040 }
  0xef   :  { %155 = vsyncpa [#allocation3], 1 }
  0xf0   :  { %156 = vsyncpa [#allocation6], 1 }
  0xf1   :  { %157 = vsyncpa [#allocation4], 1 }

</bundles_post_ra>
